<compile_context>
chip_gen: v7x
topology: tpu7x:2x2x1
jax: 0.10.0
libtpu: 0.0.40
codegen_flags: <defaults>
</compile_context>

<pallas_src>
import functools

import jax
import jax.numpy as jnp
from jax.experimental import pallas as pl
from jax.experimental.pallas import tpu as pltpu


def _se_kernel(x_ref, w1_ref, b1_ref, w2_ref, b2_ref, o_ref, h_acc, *, inv_spatial):
    # x_ref:  (tb, tc, sc)   current batch-tile x channel-tile x spatial-chunk
    # w1_ref: (tc, hid)      rows of W1 matching this channel tile
    # b1_ref: (1, hid)  w2_ref: (hid, out)  b2_ref: (1, out)   -- resident in VMEM
    # o_ref:  (tb, out)      written once, on the last reduction step
    # h_acc:  (tb, hid) f32  scratch, persists across the reduction grid axes
    j = pl.program_id(1)          # channel-tile (reduction) index
    k = pl.program_id(2)          # spatial-chunk (reduction) index

    @pl.when((j == 0) & (k == 0))
    def _init():
        h_acc[...] = jnp.zeros_like(h_acc)

    # Squeeze: partial global average pool for this tile, done on the MXU
    # (dot with ones) so it accumulates in f32 without materializing an f32
    # copy of the streamed block.
    xb = x_ref[...]                                         # (tb, tc, sc), native dtype
    tb, tc, sc = xb.shape
    ones = jnp.ones((sc, 1), dtype=xb.dtype)
    psum = jnp.dot(xb.reshape(tb * tc, sc), ones,
                   preferred_element_type=jnp.float32)      # (tb*tc, 1) f32
    pooled = psum.reshape(tb, tc) * inv_spatial             # (tb, tc) f32

    # First Linear is linear in `pooled`: accumulate this tile's contribution.
    h_acc[...] += jnp.dot(pooled.astype(w1_ref.dtype), w1_ref[...],
                          preferred_element_type=jnp.float32)           # (tb, hid)

    @pl.when((j == pl.num_programs(1) - 1) & (k == pl.num_programs(2) - 1))
    def _finalize():
        h = jnp.maximum(h_acc[...] + b1_ref[...].astype(jnp.float32), 0.0)   # bias + ReLU
        y = jnp.dot(h.astype(w2_ref.dtype), w2_ref[...],
                    preferred_element_type=jnp.float32)
        y = y + b2_ref[...].astype(jnp.float32)
        o_ref[...] = jax.nn.sigmoid(y).astype(o_ref.dtype)


def _divisors(n):
    return [d for d in range(1, n + 1) if n % d == 0]


def _select_tiles(B, C, S, itemsize, budget):
    """Pick (tb, tc, sc) preferring full-channel, full-spatial contiguous blocks."""
    tc, sc = C, S
    # tb must be a multiple of 8 or == B (output block is (tb, out_planes));
    # leave >= 2 batch tiles on the parallel axis when B is large (v7x: 2 TCs).
    cand_tb = [d for d in _divisors(B) if d == B or d % 8 == 0]
    if B >= 16:
        capped = [d for d in cand_tb if d <= B // 2]
        cand_tb = capped or cand_tb
    tb = max(cand_tb)
    while tb * tc * sc * itemsize > budget:
        smaller = [d for d in cand_tb if d < tb]
        if not smaller:
            break
        tb = max(smaller)
    # Huge feature maps: chunk the spatial (lane) axis rather than breaking
    # channel contiguity; chunks must be multiples of 128 that divide S.
    if tb * tc * sc * itemsize > budget:
        cand_sc = [d for d in _divisors(S)
                   if d % 128 == 0 and tb * tc * d * itemsize <= budget]
        if cand_sc:
            sc = max(cand_sc)
    # Last resort: shrink the channel tile (multiples of 8 or full).
    if tb * tc * sc * itemsize > budget:
        cand_tc = [d for d in _divisors(C)
                   if (d == C or d % 8 == 0) and tb * d * sc * itemsize <= budget]
        if cand_tc:
            tc = max(cand_tc)
    return tb, tc, sc


def se_layer(x, w1, b1, w2, b2, out_planes, *,
             block_b=None, block_c=None, block_s=None, block_budget_bytes=None):
    """x: (B, C, H, W) NCHW. Weights stored as (in, out). Returns (B, out_planes, 1, 1)."""
    B, C, H, W = x.shape
    S = H * W
    hid = w1.shape[1]
    assert w1.shape[0] == C and w2.shape == (hid, out_planes)
    assert b1.shape == (1, hid) and b2.shape == (1, out_planes)
    assert hid >= 1, "out_planes // reduction must be >= 1"

    itemsize = x.dtype.itemsize

    # ---- per-generation VMEM sizing (v7x: 64 MiB/TC; v5e/v6e: 128 MiB) ----
    try:
        vmem_cap = int(pltpu.get_tpu_info().vmem_capacity_bytes)
    except Exception:                       # be conservative if the query fails
        vmem_cap = 64 * 2 ** 20
    cap_limit = int(0.75 * vmem_cap)        # headroom for residents + compiler scratch
    if block_budget_bytes is None:
        block_budget_bytes = 8 * 2 ** 20 if vmem_cap <= 64 * 2 ** 20 else 24 * 2 ** 20

    # ---- tile selection (full-C / full-S preferred; shrink tb first) ----
    tb, tc, sc = _select_tiles(B, C, S, itemsize, block_budget_bytes)
    if block_b is not None:
        tb = block_b
    if block_c is not None:
        tc = block_c
    if block_s is not None:
        sc = block_s
    assert B % tb == 0 and (tb == B or tb % 8 == 0), (B, tb)
    assert C % tc == 0 and (tc == C or tc % 8 == 0), (C, tc)
    assert S % sc == 0 and (sc == S or sc % 128 == 0), (S, sc)

    x3 = x.reshape(B, C, S)                 # metadata-only; spatial axis lane-dense
    grid = (B // tb, C // tc, S // sc)

    block_bytes = tb * tc * sc * itemsize
    n_steps = grid[0] * grid[1] * grid[2]
    # Per-step compute is nil -> 3-deep stream hides DMA issue latency when it fits.
    n_buf = 3 if (n_steps >= 3 and 4 * block_bytes <= cap_limit) else 2
    vmem_limit = int(min(cap_limit, max(32 * 2 ** 20, (n_buf + 1) * block_bytes)))

    if n_buf > 2:
        x_spec = pl.BlockSpec((tb, tc, sc), lambda i, j, k: (i, j, k),
                              pipeline_mode=pl.Buffered(n_buf))
    else:
        x_spec = pl.BlockSpec((tb, tc, sc), lambda i, j, k: (i, j, k))

    cost = pl.CostEstimate(
        flops=int(2 * B * C * S + 2 * B * C * hid + 2 * B * hid * out_planes),
        transcendentals=int(B * out_planes),
        bytes_accessed=int(x.nbytes + w1.nbytes + b1.nbytes + w2.nbytes + b2.nbytes
                           + B * out_planes * itemsize),
    )

    kernel = functools.partial(_se_kernel, inv_spatial=1.0 / float(S))

    y = pl.pallas_call(
        kernel,
        out_shape=jax.ShapeDtypeStruct((B, out_planes), x.dtype),
        grid_spec=pltpu.PrefetchScalarGridSpec(
            num_scalar_prefetch=0,
            grid=grid,
            in_specs=[
                x_spec,                                                   # x tiles (streamed)
                pl.BlockSpec((tc, hid), lambda i, j, k: (j, 0)),          # matching W1 rows
                pl.BlockSpec((1, hid), lambda i, j, k: (0, 0)),           # b1 (resident)
                pl.BlockSpec((hid, out_planes), lambda i, j, k: (0, 0)),  # W2 (resident)
                pl.BlockSpec((1, out_planes), lambda i, j, k: (0, 0)),    # b2 (resident)
            ],
            out_specs=pl.BlockSpec((tb, out_planes), lambda i, j, k: (i, 0)),
            scratch_shapes=[pltpu.VMEM((tb, hid), jnp.float32)],
        ),
        compiler_params=pltpu.CompilerParams(
            dimension_semantics=("parallel", "arbitrary", "arbitrary"),
            vmem_limit_bytes=vmem_limit,
        ),
        cost_estimate=cost,
    )(x3, w1, b1, w2, b2)
    return y.reshape(B, out_planes, 1, 1)


def init_se_params(key, in_planes, out_planes, reduction=16, dtype=jnp.float32):
    """Deterministic synthetic parameters. Weights stored as (in, out)."""
    hidden = out_planes // reduction      # matches the PyTorch module (out_planes // reduction)
    k1, k2, k3, k4 = jax.random.split(key, 4)
    w1 = jax.random.uniform(k1, (in_planes, hidden), dtype,
                            minval=-1.0, maxval=1.0) / jnp.sqrt(float(in_planes))
    b1 = jax.random.uniform(k2, (1, hidden), dtype,
                            minval=-1.0, maxval=1.0) / jnp.sqrt(float(in_planes))
    w2 = jax.random.uniform(k3, (hidden, out_planes), dtype,
                            minval=-1.0, maxval=1.0) / jnp.sqrt(float(hidden))
    b2 = jax.random.uniform(k4, (1, out_planes), dtype,
                            minval=-1.0, maxval=1.0) / jnp.sqrt(float(hidden))
    return w1, b1, w2, b2


if __name__ == "__main__":
    # Small shapes consistent with the module: in_planes = C, hidden = out_planes // reduction.
    B, C, H, W = 2, 32, 16, 16
    in_planes, out_planes, reduction = C, 32, 16          # hidden = 2

    key = jax.random.PRNGKey(0)
    kx, kp = jax.random.split(key)
    x = jax.random.normal(kx, (B, C, H, W), dtype=jnp.float32)
    w1, b1, w2, b2 = init_se_params(kp, in_planes, out_planes, reduction)

    # Pure-JAX reference of the same math.
    pooled = jnp.mean(x, axis=(2, 3))
    ref = jax.nn.sigmoid(jnp.maximum(pooled @ w1 + b1, 0.0) @ w2 + b2)
    ref = ref.reshape(B, out_planes, 1, 1)

    # 1) Auto tiling: full-channel / full-spatial block at these small shapes.
    out = jax.block_until_ready(se_layer(x, w1, b1, w2, b2, out_planes))
    assert out.shape == (B, out_planes, 1, 1)
    assert jnp.allclose(out, ref, atol=1e-5, rtol=1e-5)

    # 2) Force the tiled-reduction path (channel tiles of 8, spatial chunks of 128)
    #    so the accumulate + @pl.when finalize pipeline and 3-deep buffering are
    #    actually exercised at small shapes.
    out2 = jax.block_until_ready(
        se_layer(x, w1, b1, w2, b2, out_planes, block_b=B, block_c=8, block_s=128))
    assert jnp.allclose(out2, ref, atol=1e-5, rtol=1e-5)

    print("KERNEL_OK")
</pallas_src>

<mosaic_0001>
module attributes {stable_mosaic.version = 11 : i64} {
  func.func @_se_kernel(%arg0: i32, %arg1: i32, %arg2: i32, %arg3: memref<2x32x256xf32, #tpu.memory_space<vmem>>, %arg4: memref<32x2xf32, #tpu.memory_space<vmem>>, %arg5: memref<1x2xf32, #tpu.memory_space<vmem>>, %arg6: memref<2x32xf32, #tpu.memory_space<vmem>>, %arg7: memref<1x32xf32, #tpu.memory_space<vmem>>, %arg8: memref<2x32xf32, #tpu.memory_space<vmem>>, %arg9: memref<2x2xf32, #tpu.memory_space<vmem>>) attributes {dimension_semantics = [#tpu.dimension_semantics<parallel>, #tpu.dimension_semantics<arbitrary>, #tpu.dimension_semantics<arbitrary>], iteration_bounds = array<i64: 1, 1, 1>, scalar_prefetch = 0 : i64, scratch_operands = 1 : i64, tpu.core_type = #tpu.core_type<tc>, window_params = [{transform_indices = @transform_0, window_bounds = array<i64: 2, 32, 256>}, {transform_indices = @transform_1, window_bounds = array<i64: 32, 2>}, {pipeline_mode = #tpu.pipeline_mode<synchronous>, transform_indices = @transform_2, window_bounds = array<i64: 1, 2>}, {pipeline_mode = #tpu.pipeline_mode<synchronous>, transform_indices = @transform_3, window_bounds = array<i64: 2, 32>}, {pipeline_mode = #tpu.pipeline_mode<synchronous>, transform_indices = @transform_4, window_bounds = array<i64: 1, 32>}, {transform_indices = @transform_5, window_bounds = array<i64: 2, 32>}]} {
    %c0_i32 = arith.constant 0 : i32
    %0 = arith.cmpi eq, %arg1, %c0_i32 : i32
    %c0_i32_0 = arith.constant 0 : i32
    %1 = arith.cmpi eq, %arg2, %c0_i32_0 : i32
    %2 = arith.andi %0, %1 : i1
    %3 = arith.extui %2 : i1 to i32
    %c0_i32_1 = arith.constant 0 : i32
    %4 = arith.cmpi ne, %3, %c0_i32_1 : i32
    scf.if %4 {
      %cst_16 = arith.constant 0.000000e+00 : f32
      %22 = vector.broadcast %cst_16 : f32 to vector<2x2xf32>
      %c0_17 = arith.constant 0 : index
      %c0_18 = arith.constant 0 : index
      %23 = vector.load %arg9[%c0_17, %c0_18] : memref<2x2xf32, #tpu.memory_space<vmem>>, vector<2x2xf32>
      tpu.vector_store %arg9[%c0_17, %c0_18], %22 {strides = array<i32>} : memref<2x2xf32, #tpu.memory_space<vmem>>, vector<2x2xf32>,
    } else {
    }
    %c0 = arith.constant 0 : index
    %c0_2 = arith.constant 0 : index
    %c0_3 = arith.constant 0 : index
    %5 = vector.load %arg3[%c0, %c0_2, %c0_3] : memref<2x32x256xf32, #tpu.memory_space<vmem>>, vector<2x32x256xf32>
    %cst = arith.constant 1.000000e+00 : f32
    %6 = vector.broadcast %cst : f32 to vector<256x1xf32>
    %7 = vector.shape_cast %5 : vector<2x32x256xf32> to vector<64x256xf32>
    %cst_4 = arith.constant dense<0.000000e+00> : vector<64x1xf32>
    %8 = tpu.matmul %7, %6, %cst_4 {dimension_numbers = #tpu.dot_dimension_numbers<[1], [0], [0], [1], [0, 0, 1, 1], [], []>} : vector<64x256xf32>, vector<256x1xf32>, vector<64x1xf32> -> vector<64x1xf32>
    %9 = vector.shape_cast %8 : vector<64x1xf32> to vector<2x32xf32>
    %cst_5 = arith.constant 3.906250e-03 : f32
    %10 = vector.broadcast %cst_5 : f32 to vector<2x32xf32>
    %11 = arith.mulf %9, %10 : vector<2x32xf32>
    %c0_6 = arith.constant 0 : index
    %c0_7 = arith.constant 0 : index
    %12 = vector.load %arg9[%c0_6, %c0_7] : memref<2x2xf32, #tpu.memory_space<vmem>>, vector<2x2xf32>
    %c0_8 = arith.constant 0 : index
    %c0_9 = arith.constant 0 : index
    %13 = vector.load %arg4[%c0_8, %c0_9] : memref<32x2xf32, #tpu.memory_space<vmem>>, vector<32x2xf32>
    %cst_10 = arith.constant dense<0.000000e+00> : vector<2x2xf32>
    %14 = tpu.matmul %11, %13, %cst_10 {dimension_numbers = #tpu.dot_dimension_numbers<[1], [0], [0], [1], [0, 0, 1, 1], [], []>} : vector<2x32xf32>, vector<32x2xf32>, vector<2x2xf32> -> vector<2x2xf32>
    %15 = arith.addf %12, %14 : vector<2x2xf32>
    %c0_11 = arith.constant 0 : index
    %c0_12 = arith.constant 0 : index
    %16 = vector.load %arg9[%c0_11, %c0_12] : memref<2x2xf32, #tpu.memory_space<vmem>>, vector<2x2xf32>
    tpu.vector_store %arg9[%c0_11, %c0_12], %15 {strides = array<i32>} : memref<2x2xf32, #tpu.memory_space<vmem>>, vector<2x2xf32>,
    %c0_i32_13 = arith.constant 0 : i32
    %17 = arith.cmpi eq, %arg1, %c0_i32_13 : i32
    %c0_i32_14 = arith.constant 0 : i32
    %18 = arith.cmpi eq, %arg2, %c0_i32_14 : i32
    %19 = arith.andi %17, %18 : i1
    %20 = arith.extui %19 : i1 to i32
    %c0_i32_15 = arith.constant 0 : i32
    %21 = arith.cmpi ne, %20, %c0_i32_15 : i32
    scf.if %21 {
      %c0_16 = arith.constant 0 : index
      %c0_17 = arith.constant 0 : index
      %22 = vector.load %arg9[%c0_16, %c0_17] : memref<2x2xf32, #tpu.memory_space<vmem>>, vector<2x2xf32>
      %c0_18 = arith.constant 0 : index
      %c0_19 = arith.constant 0 : index
      %23 = vector.load %arg5[%c0_18, %c0_19] : memref<1x2xf32, #tpu.memory_space<vmem>>, vector<1x2xf32>
      %24 = vector.broadcast %23 : vector<1x2xf32> to vector<2x2xf32>
      %25 = arith.addf %22, %24 : vector<2x2xf32>
      %cst_20 = arith.constant 0.000000e+00 : f32
      %26 = vector.broadcast %cst_20 : f32 to vector<2x2xf32>
      %27 = arith.maximumf %25, %26 : vector<2x2xf32>
      %c0_21 = arith.constant 0 : index
      %c0_22 = arith.constant 0 : index
      %28 = vector.load %arg6[%c0_21, %c0_22] : memref<2x32xf32, #tpu.memory_space<vmem>>, vector<2x32xf32>
      %cst_23 = arith.constant dense<0.000000e+00> : vector<2x32xf32>
      %29 = tpu.matmul %27, %28, %cst_23 {dimension_numbers = #tpu.dot_dimension_numbers<[1], [0], [0], [1], [0, 0, 1, 1], [], []>} : vector<2x2xf32>, vector<2x32xf32>, vector<2x32xf32> -> vector<2x32xf32>
      %c0_24 = arith.constant 0 : index
      %c0_25 = arith.constant 0 : index
      %30 = vector.load %arg7[%c0_24, %c0_25] : memref<1x32xf32, #tpu.memory_space<vmem>>, vector<1x32xf32>
      %31 = vector.broadcast %30 : vector<1x32xf32> to vector<2x32xf32>
      %32 = arith.addf %29, %31 : vector<2x32xf32>
      %33 = arith.negf %32 : vector<2x32xf32>
      %34 = math.exp %33 : vector<2x32xf32>
      %cst_26 = arith.constant 1.000000e+00 : f32
      %35 = vector.broadcast %cst_26 : f32 to vector<2x32xf32>
      %36 = arith.addf %35, %34 : vector<2x32xf32>
      %37 = arith.divf %35, %36 : vector<2x32xf32>
      %c0_27 = arith.constant 0 : index
      %c0_28 = arith.constant 0 : index
      %38 = vector.load %arg8[%c0_27, %c0_28] : memref<2x32xf32, #tpu.memory_space<vmem>>, vector<2x32xf32>
      tpu.vector_store %arg8[%c0_27, %c0_28], %37 {strides = array<i32>} : memref<2x32xf32, #tpu.memory_space<vmem>>, vector<2x32xf32>,
    } else {
    }
    return
  }
  func.func @transform_0(%arg0: i32, %arg1: i32, %arg2: i32) -> (i32, i32, i32) {
    %c0_i32 = arith.constant 0 : i32
    return %arg0, %arg1, %arg2 : i32, i32, i32
  }
  func.func @transform_1(%arg0: i32, %arg1: i32, %arg2: i32) -> (i32, i32) {
    %c0_i32 = arith.constant 0 : i32
    %c0_i32_0 = arith.constant 0 : i32
    return %arg1, %c0_i32 : i32, i32
  }
  func.func @transform_2(%arg0: i32, %arg1: i32, %arg2: i32) -> (i32, i32) {
    %c0_i32 = arith.constant 0 : i32
    %c0_i32_0 = arith.constant 0 : i32
    %c0_i32_1 = arith.constant 0 : i32
    return %c0_i32, %c0_i32_0 : i32, i32
  }
  func.func @transform_3(%arg0: i32, %arg1: i32, %arg2: i32) -> (i32, i32) {
    %c0_i32 = arith.constant 0 : i32
    %c0_i32_0 = arith.constant 0 : i32
    %c0_i32_1 = arith.constant 0 : i32
    return %c0_i32, %c0_i32_0 : i32, i32
  }
  func.func @transform_4(%arg0: i32, %arg1: i32, %arg2: i32) -> (i32, i32) {
    %c0_i32 = arith.constant 0 : i32
    %c0_i32_0 = arith.constant 0 : i32
    %c0_i32_1 = arith.constant 0 : i32
    return %c0_i32, %c0_i32_0 : i32, i32
  }
  func.func @transform_5(%arg0: i32, %arg1: i32, %arg2: i32) -> (i32, i32) {
    %c0_i32 = arith.constant 0 : i32
    %c0_i32_0 = arith.constant 0 : i32
    return %arg0, %c0_i32 : i32, i32
  }
}

</mosaic_0001>

<bundles_post_ra>
// kernel: tpu_custom_call.1
= control target key start
LH: loop header
LB: loop body
LE: loop exit
PB: predicated region body
PF: predicated region fallthrough
CT: control target
= control target key end

     0   :  { %10 = vsyncpa [#allocation4], 0  ;;  %s728_s0 = inlined_call_operand.hbm [shape: f32[2,32,256], index: 0, kind: input, shape index: {}]   ;;  %s729_s1 = inlined_call_operand.vmem [shape: f32[32,2], index: 1, kind: input, shape index: {}]   ;;  %s730_s2 = inlined_call_operand.vmem [shape: f32[1,2], index: 2, kind: input, shape index: {}]   ;;  %s731_s3 = inlined_call_operand.vmem [shape: f32[2,32], index: 3, kind: input, shape index: {}]   ;;  %s732_s4 = inlined_call_operand.vmem [shape: f32[1,32], index: 4, kind: input, shape index: {}]   ;;  %s733_s5 = inlined_call_operand.hbm [shape: f32[2,32], index: 5, kind: output, shape index: {}]  }
   0x1   :  { %11 = vsyncpa [#allocation5], 0  ;;  %s640_s18 = smov [#allocation3]   ;;  %s592_s22 = scalar_lea.hbm %s728_s0, 2048 }
   0x2   :  { %s17_s19 = sshll.u32 %s640_s18, 4  ;;  %p593_p0 = scmp.ne.s32.totalorder %s728_s0, %s592_s22  ;;  %s18_s19 = int_to_ptr.vmem [resolvable:$true] %s17_s19 }
   0x3   :  { %p596_p1 = scmp.lt.u32.totalorder %s592_s22, %s728_s0 }
   0x5   :  { %p598_p2 = pnand %p596_p1, %p593_p0 }
   0x7   :  { %601 = shalt.err (!%p598_p2)
}
   0x8   :  { %s602_s27 = scalar_lea.vmem %s18_s19, 2048  ;;  %p607_p4 = scmp.lt.s32.totalorder %s18_s19, %s18_s19 }
   0x9   :  { %p603_p3 = scmp.ne.s32.totalorder %s18_s19, %s602_s27  ;;  %p608_p5 = scmp.lt.s32.totalorder %s602_s27, %s602_s27 }
   0xb   :  { %p609_p6 = por %p608_p5, %p607_p4 }
   0xd   :  { %p610_p7 = pnand %p609_p6, %p603_p3 }
   0xf   :  { %613 = shalt.err (!%p610_p7)
}
  0x10   :  { %s641_s28 = smov 256   ;;  %s642_s29 = smov 16  }
  0x11   :  { %23 = dma.hbm_to_vmem [thread:$0]  %s728_s0, 2048, %s18_s19, [#allocation4], %s641_s28, %s641_s28, %s642_s29  }
  0x12   :  { %636 = dma.done.wait [#allocation4], 2048  }
  0x13   :  { %637 = vsyncadd [#allocation4], 4294965248  ;;  %v643_v0 = vmov 1.0|1.0   ;;  %v44_v1 = vld [vmem:[#allocation3 + $0x8] sm:$0xff]  ;;  %v54_v2 = vld [vmem:[#allocation3 + $0x58] sm:$0xff]  ;;  %v209_v59 = vlaneseq }
  0x14   :  { %539 = vmatprep.subr.bf16.mxu0 %v643_v0  ;;  %561 = vmatprep.subr.bf16.mxu1 %v643_v0  ;;  %v43_v3 = vld [vmem:[#allocation3] sm:$0xff]  ;;  %v53_v4 = vld [vmem:[#allocation3 + $0x50] sm:$0xff]  ;;  %v46_v5 = vld [vmem:[#allocation3 + $0x18] sm:$0xff]  ;;  %v644_v17 = vmov 0   ;;  %v645_v47 = vmov 0.0|0.0   ;;  %vm41_vm0 = vcmask 9216  }
  0x15   :  { %540 = vmatpush3.bf16.msra.mxu0 %v643_v0  ;;  %569 = vmatpush3.bf16.msra.mxu1 %v643_v0  ;;  %v56_v6 = vld [vmem:[#allocation3 + $0x68] sm:$0xff]  ;;  %v45_v7 = vld [vmem:[#allocation3 + $0x10] sm:$0xff]  ;;  %v55_v8 = vld [vmem:[#allocation3 + $0x60] sm:$0xff]  ;;  %vm646_vm1 = vmmov 0   ;;  %v647_v57 = vmov 0.0   ;;  %v210_v62 = vand.u32 127, %v209_v59 }
  0x16   :  { %541 = vmatprep.subr.bf16.mxu0 %v643_v0  ;;  %562 = vmatprep.subr.bf16.mxu1 %v643_v0  ;;  %v48_v9 = vld [vmem:[#allocation3 + $0x28] sm:$0xff]  ;;  %v58_v10 = vld [vmem:[#allocation3 + $0x78] sm:$0xff]  ;;  %v47_v11 = vld [vmem:[#allocation3 + $0x20] sm:$0xff]  ;;  %42 = vst.msk [vmem:[#allocation2] sm:$0x3] %vm41_vm0, %v647_v57  ;;  %vm220_vm2 = vcmask 130112  }
  0x17   :  { %123 = vmatprep.mubr.f32.mxu0 %v44_v1  ;;  %148 = vmatprep.mubr.f32.mxu1 %v54_v2  ;;  %v57_v12 = vld [vmem:[#allocation3 + $0x70] sm:$0xff]  ;;  %v50_v13 = vld [vmem:[#allocation3 + $0x38] sm:$0xff]  ;;  %v52_v15 = vld [vmem:[#allocation3 + $0x48] sm:$0xff]  ;;  %v215_v63 = vadd.s32 4294967288, %v210_v62  ;;  %v212_v2 = vshrl.u32 %v209_v59, 7  ;;  %vm227_vm3 = vcmask 195712  }
  0x18   :  { %v49_v14 = vld [vmem:[#allocation3 + $0x30] sm:$0xff]  ;;  %v51_v16 = vld [vmem:[#allocation3 + $0x40] sm:$0xff]  ;;  %586 = vset.pattern.permute.xlu0 %v644_v17  ;;  %587 = vset.pattern.permute.xlu1 %v644_v17  ;;  %vm234_vm4 = vcmask 261312   ;;  %vm255_vm5 = vcmask 1041409   ;;  %vm257_vm6 = vcmask 261120   ;;  %vm357_vm7 = vcmask 1041408  }
  0x19   :  { %542 = vmatpush3.bf16.msra.mxu0 %v643_v0  ;;  %570 = vmatpush3.bf16.msra.mxu1 %v643_v0  ;;  %v173_v50 = vld [vmem:[%s729_s1] sm:$0xff]  ;;  %v174_v51 = vld [vmem:[%s729_s1 + $0x8] sm:$0xff]  ;;  %v175_v54 = vld [vmem:[%s729_s1 + $0x10] sm:$0xff]  ;;  %vm353_vm8 = vcmask 15360   ;;  %vm437_vm9 = vcmask 254976  }
  0x1a   :  { %543 = vmatprep.subr.bf16.mxu0 %v643_v0  ;;  %563 = vmatprep.subr.bf16.mxu1 %v643_v0  ;;  %v556_v52 = vpack.c.bf16 %v174_v51, %v173_v50  ;;  %v176_v55 = vld [vmem:[%s729_s1 + $0x18] sm:$0xff] }
  0x1b   :  { %v559_v56 = vpack.c.bf16 %v176_v55, %v175_v54 }
  0x1d   :  { %544 = vmatpush3.bf16.msra.mxu0 %v643_v0  ;;  %571 = vmatpush3.bf16.msra.mxu1 %v643_v0 }
  0x1e   :  { %545 = vmatprep.subr.bf16.mxu0 %v643_v0  ;;  %564 = vmatprep.subr.bf16.mxu1 %v643_v0 }
  0x21   :  { %546 = vmatpush3.bf16.msra.mxu0 %v643_v0  ;;  %572 = vmatpush3.bf16.msra.mxu1 %v643_v0 }
  0x22   :  { %547 = vmatprep.subr.bf16.mxu0 %v643_v0  ;;  %565 = vmatprep.subr.bf16.mxu1 %v643_v0 }
  0x25   :  { %548 = vmatpush3.bf16.msra.mxu0 %v643_v0  ;;  %573 = vmatpush3.bf16.msra.mxu1 %v643_v0 }
  0x26   :  { %549 = vmatprep.subr.bf16.mxu0 %v643_v0  ;;  %566 = vmatprep.subr.bf16.mxu1 %v643_v0 }
  0x29   :  { %550 = vmatpush3.bf16.msra.mxu0 %v643_v0  ;;  %574 = vmatpush3.bf16.msra.mxu1 %v643_v0 }
  0x2a   :  { %551 = vmatprep.subr.bf16.mxu0 %v643_v0  ;;  %567 = vmatprep.subr.bf16.mxu1 %v643_v0 }
  0x2d   :  { %552 = vmatpush3.bf16.msra.mxu0 %v643_v0  ;;  %575 = vmatpush3.bf16.msra.mxu1 %v643_v0 }
  0x2e   :  { %553 = vmatprep.subr.bf16.mxu0 %v643_v0  ;;  %568 = vmatprep.subr.bf16.mxu1 %v643_v0 }
  0x31   :  { %554 = vmatpush3.bf16.msra.mxu0 %v643_v0  ;;  %576 = vmatpush3.bf16.msra.mxu1 %v643_v0  ;;  %v222_v0 = vadd.s32 4294967280, %v210_v62 }
  0x32   :  { %555 = vmatprep.subr.bf16.mxu1 %v645_v47 }
  0x34   :  { %124 = vmatmul.mubr.f32.vlgmr.msra.gmra.mrb[0].mxu0 %v43_v3  ;;  %149 = vmatmul.mubr.f32.vlgmr.msra.gmra.mrb[0].mxu1 %v53_v4  ;;  %v229_v3 = vadd.s32 4294967272, %v210_v62 }
  0x35   :  { %128 = vmatprep.mubr.f32.mxu0 %v46_v5  ;;  %153 = vmatprep.mubr.f32.mxu1 %v56_v6  ;;  %v218_v5 = vsub.s32 %v215_v63, %v212_v2  ;;  %v225_v6 = vsub.s32 %v222_v0, %v212_v2 }
  0x36   :  { %557 = vmatpush3.bf16.msra.mxu1 %v556_v52 }
  0x37   :  { %558 = vmatprep.subr.bf16.mxu1 %v645_v47 }
  0x38   :  { %129 = vmatmul.mubr.f32.gmra.mrb[2].mxu0 %v45_v7  ;;  %154 = vmatmul.mubr.f32.gmra.mrb[2].mxu1 %v55_v8  ;;  %v213_v7 = vsub.s32 %v210_v62, %v212_v2  ;;  %v232_v8 = vsub.s32 %v229_v3, %v212_v2 }
  0x39   :  { %133 = vmatprep.mubr.f32.mxu0 %v48_v9  ;;  %158 = vmatprep.mubr.f32.mxu1 %v58_v10 }
  0x3a   :  { %560 = vmatpush3.bf16.msra.mxu1 %v559_v56 }
  0x3b   :  { %534 = vmatprep.subr.mxu1 %v647_v57 }
  0x3c   :  { %134 = vmatmul.mubr.f32.gmra.mrb[4].mxu0 %v47_v11  ;;  %159 = vmatmul.mubr.f32.gmra.mrb[4].mxu1 %v57_v12 }
  0x3d   :  { %138 = vmatprep.mubr.f32.mxu0 %v50_v13  ;;  %531 = vmatprep.mubr.msk.f32.mxu1 %vm646_vm1, %v647_v57 }
  0x40   :  { %139 = vmatmul.mubr.f32.gmra.mrb[6].mxu0 %v49_v14 }
  0x41   :  { %143 = vmatprep.mubr.f32.mxu0 %v52_v15 }
  0x44   :  { %144 = vmatmul.mubr.f32.gmra.mrb[8].mxu0 %v51_v16 }
 0x107   :  { %v492_v18 = vpop.f32.mrb[0].mxu0  ;;  %v507_v19 = vpop.f32.mrb[0].mxu1 }
 0x108   :  { %v493_v20 = vpop.f32.mrb[1].mxu0  ;;  %v508_v21 = vpop.f32.mrb[1].mxu1 }
 0x109   :  { %v494_v22 = vadd.f32 %v493_v20, %v492_v18  ;;  %v509_v23 = vadd.f32 %v508_v21, %v507_v19 }
 0x10b   :  { %v164_v24 = vmul.f32 0.00390625, %v494_v22  ;;  %v495_v25 = vpop.f32.mrb[2].mxu0  ;;  %v169_v26 = vmul.f32 0.00390625, %v509_v23  ;;  %v510_v27 = vpop.f32.mrb[2].mxu1 }
 0x10c   :  { %v496_v28 = vpop.f32.mrb[3].mxu0  ;;  %v511_v29 = vpop.f32.mrb[3].mxu1 }
 0x10d   :  { %v497_v30 = vadd.f32 %v496_v28, %v495_v25  ;;  %186 = vperm.xlu0 %586, %v164_v24   ;;  %v512_v31 = vadd.f32 %v511_v29, %v510_v27  ;;  %201 = vperm.xlu1 %587, %v169_v26   ;;  %v345_v27 = vld [vmem:[%s731_s3] sm:$0x3]  ;;  %s648_s3 = smov [#allocation6]  }
 0x10e   :  { %v172_v28 = vld [vmem:[#allocation2] sm:$0x3]  ;;  %s445_s19 = sshll.u32 %s648_s3, 4  ;;  %s446_s19 = int_to_ptr.vmem [resolvable:$true] %s445_s19 }
 0x10f   :  { %v165_v32 = vmul.f32 0.00390625, %v497_v30  ;;  %v498_v33 = vpop.f32.mrb[4].mxu0  ;;  %v170_v34 = vmul.f32 0.00390625, %v512_v31  ;;  %v513_v35 = vpop.f32.mrb[4].mxu1  ;;  %p619_p9 = scmp.lt.s32.totalorder %s446_s19, %s446_s19 }
 0x110   :  { %v499_v36 = vpop.f32.mrb[5].mxu0  ;;  %v514_v37 = vpop.f32.mrb[5].mxu1 }
 0x111   :  { %v500_v38 = vadd.f32 %v499_v36, %v498_v33  ;;  %189 = vperm.xlu0 %586, %v165_v32   ;;  %204 = vperm.xlu1 %587, %v170_v34   ;;  %v515_v39 = vadd.f32 %v514_v37, %v513_v35  ;;  %v455_v32 = vld [vmem:[%s730_s2] ss:$0 sm:$0xff]  ;;  %s614_s2 = scalar_lea.vmem %s446_s19, 32 }
 0x112   :  { %v456_v36 = vld [vmem:[%s732_s4] ss:$0 sm:$0xff]  ;;  %p615_p8 = scmp.ne.s32.totalorder %s446_s19, %s614_s2  ;;  %p620_p10 = scmp.lt.s32.totalorder %s614_s2, %s614_s2 }
 0x113   :  { %v166_v40 = vmul.f32 0.00390625, %v500_v38  ;;  %v501_v41 = vpop.f32.mrb[6].mxu0  ;;  %v171_v53 = vmul.f32 0.00390625, %v515_v39 }
 0x114   :  { %v502_v42 = vpop.f32.mrb[7].mxu0  ;;  %p621_p11 = por %p620_p10, %p619_p9 }
 0x115   :  { %v503_v43 = vadd.f32 %v502_v42, %v501_v41  ;;  %192 = vperm.xlu0 %586, %v166_v40  }
 0x116   :  { %p622_p12 = pnand %p621_p11, %p615_p8 }
 0x117   :  { %v167_v44 = vmul.f32 0.00390625, %v503_v43  ;;  %v504_v45 = vpop.f32.mrb[8].mxu0 }
 0x118   :  { %v505_v46 = vpop.f32.mrb[9].mxu0 }
 0x119   :  { %v506_v48 = vadd.f32 %v505_v46, %v504_v45  ;;  %195 = vperm.xlu0 %586, %v167_v44  }
 0x11b   :  { %v168_v49 = vmul.f32 0.00390625, %v506_v48 }
 0x11d   :  { %198 = vperm.xlu1 %587, %v168_v49  }
 0x121   :  { %207 = vperm.xlu1 %587, %v171_v53  }
 0x18c   :  { %v187_v58 = vpop.permute.xlu0 %186  ;;  %v202_v61 = vpop.permute.xlu1 %201 }
 0x18d   :  { %v243_v11 = vrot.slane %v202_v61, %v218_v5  ;;  %v214_v15 = vrot.slane %v187_v58, %v213_v7 }
 0x190   :  { %v190_v60 = vpop.permute.xlu0 %189  ;;  %v205_v4 = vpop.permute.xlu1 %204 }
 0x191   :  { %v219_v12 = vrot.slane %v190_v60, %v218_v5  ;;  %v248_v18 = vrot.slane %v205_v4, %v225_v6 }
 0x193   :  { %v221_v20 = vsel %vm220_vm2, %v219_v12, %v214_v15 }
 0x194   :  { %v193_v1 = vpop.permute.xlu0 %192 }
 0x195   :  { %v226_v14 = vrot.slane %v193_v1, %v225_v6 }
 0x197   :  { %v228_v22 = vsel %vm227_vm3, %v226_v14, %v221_v20 }
 0x198   :  { %v196_v9 = vpop.permute.xlu0 %195 }
 0x199   :  { %v233_v16 = vrot.slane %v196_v9, %v232_v8 }
 0x19b   :  { %v235_v24 = vsel %vm234_vm4, %v233_v16, %v228_v22 }
 0x19c   :  { %v199_v10 = vpop.permute.xlu1 %198 }
 0x19d   :  { %v239_v13 = vrot.slane %v199_v10, %v213_v7 }
 0x19f   :  { %v244_v17 = vsel %vm220_vm2, %v243_v11, %v239_v13 }
 0x1a0   :  { %v208_v19 = vpop.permute.xlu1 %207  ;;  %v249_v23 = vsel %vm227_vm3, %v248_v18, %v244_v17 }
 0x1a1   :  { %v253_v21 = vrot.slane %v208_v19, %v232_v8 }
 0x1a3   :  { %v254_v25 = vsel %vm234_vm4, %v253_v21, %v249_v23 }
 0x1a4   :  { %v256_v26 = vsel %vm255_vm5, %v254_v25, %v235_v24 }
 0x1a5   :  { %532 = vmatmul.mubr.msk.f32.vlgmr.msra.gmra.mrb[6].mxu1 %vm257_vm6, %v256_v26 }
 0x1a6   :  { %536 = vmatprep.mubr.msk.f32.mxu1 %vm646_vm1, %v647_v57  ;;  %535 = vmatpush3.msk.msra.mxu1 %vm357_vm7, %v345_v27 }
 0x278   :  { %v326_v29 = vpop.f32.mrb[6].mxu1 }
 0x279   :  { %v330_v30 = vadd.f32 %v326_v29, %v172_v28  ;;  %v533_v31 = vpop.f32.mrb[7].mxu1 }
 0x27b   :  { %332 = vst.msk [vmem:[#allocation2] sm:$0x3] %vm41_vm0, %v330_v30 }
 0x282   :  { %v335_v33 = vld [vmem:[#allocation2] sm:$0x3] }
 0x283   :  { %v343_v34 = vadd.f32 %v455_v32, %v335_v33 }
 0x285   :  { %v344_v35 = vmax.f32 %v343_v34, 0.0 }
 0x287   :  { %537 = vmatmul.mubr.msk.f32.vlgmr.msra.gmra.mrb[8].mxu1 %vm353_vm8, %v344_v35 }
 0x35a   :  { %v427_v37 = vpop.f32.mrb[8].mxu1 }
 0x35b   :  { %v428_v38 = vadd.f32 %v456_v36, %v427_v37  ;;  %v538_v39 = vpop.f32.mrb[9].mxu1 }
 0x35d   :  { %v459_v40 = vmul.f32 -1.442695, %v428_v38 }
 0x35f   :  { %588 = vpow2.f32 %v459_v40 }
 0x369   :  { %v589_v41 = vpop.eup %588 }
 0x36a   :  { %v434_v42 = vadd.f32 1.0, %v589_v41 }
 0x36c   :  { %590 = vrcp.f32 %v434_v42 }
 0x376   :  { %v591_v43 = vpop.eup %590 }
 0x377   :  { %438 = vst.msk [vmem:[#allocation6] sm:$0x3] %vm437_vm9, %v591_v43 }
 0x378   :  { %625 = shalt.err (!%p622_p12)
}
 0x379   :  { %s626_s21 = scalar_lea.hbm %s733_s5, 32 }
 0x37a   :  { %p627_p13 = scmp.ne.s32.totalorder %s733_s5, %s626_s21  ;;  %p630_p0 = scmp.lt.u32.totalorder %s626_s21, %s733_s5 }
 0x37c   :  { %p632_p1 = pnand %p630_p0, %p627_p13 }
 0x37e   :  { %635 = shalt.err (!%p632_p1)
}
 0x37f   :  { %448 = dma.vmem_to_hbm [thread:$0]  %s446_s19, 32, %s733_s5, [#allocation5]  }
 0x380   :  { %638 = dma.done.wait [#allocation5], 32  }
 0x381   :  { %639 = vsyncadd [#allocation5], 4294967264 }
 0x382   :  { %452 = vsyncpa [#allocation4], 1 }
 0x383   :  { %453 = vsyncpa [#allocation5], 1 }

</bundles_post_ra>
